<compile_context>
chip_gen: v6e
topology: v6e:2x2x1
jax: 0.10.0
libtpu: 0.0.40
codegen_flags: <defaults>
</compile_context>

<pallas_src>
import functools

import jax
import jax.numpy as jnp
from jax import lax
from jax.experimental import pallas as pl
from jax.experimental.pallas import tpu as pltpu

_NEG_INF = -1e30  # large-negative rather than -inf: avoids inf-inf NaN paths


def _ntxent_lse_kernel(q_ref, k_ref, lse_ref, m_scr, l_scr, *,
                       block_m, block_n, chunk, inv_temp, n_valid, has_pad):
    """One (row-tile i, column-tile j) step of the online logsumexp.

    q_ref:   (block_m, D) bf16   L2-normalized rows (row operand)
    k_ref:   (block_n, D) bf16   L2-normalized rows (column operand)
    lse_ref: (block_m, 1) f32    per-row logsumexp over c != r (written at last j)
    m_scr / l_scr: (block_m, 1) f32 running max / running sum-of-exp
    """
    i = pl.program_id(0)
    j = pl.program_id(1)
    nj = pl.num_programs(1)

    @pl.when(j == 0)
    def _init():
        m_scr[...] = jnp.full_like(m_scr, _NEG_INF)
        l_scr[...] = jnp.zeros_like(l_scr)

    row0 = i * block_m
    col0 = j * block_n
    q = q_ref[...]                                           # (block_m, D) bf16
    r_idx = lax.broadcasted_iota(jnp.int32, (block_m, chunk), 0) + row0

    # Process the column tile in lane sub-chunks: the f32 similarity chunk,
    # its mask and the exp/max/sum tail stay close to the register file
    # instead of round-tripping a (block_m, block_n) f32 tile through VMEM.
    for c0 in range(0, block_n, chunk):
        k_c = k_ref[c0:c0 + chunk, :]                        # (chunk, D) bf16
        # bf16 x bf16 -> f32 on the MXU, contracting the feature dim of BOTH
        # operands (no transpose of the column operand is materialized).
        s = lax.dot_general(q, k_c,
                            dimension_numbers=(((1,), (1,)), ((), ())),
                            preferred_element_type=jnp.float32)
        s = s * jnp.float32(inv_temp)                        # scale in f32 (VPU)

        # Mask self-similarity (diagonal) and, when present, padded columns.
        c_idx = lax.broadcasted_iota(jnp.int32, (block_m, chunk), 1) + (col0 + c0)
        bad = r_idx == c_idx
        if has_pad:
            bad = jnp.logical_or(bad, c_idx >= n_valid)
        s = jnp.where(bad, jnp.float32(_NEG_INF), s)

        # Online (flash-style) logsumexp update.
        m_prev = m_scr[...]
        m_new = jnp.maximum(m_prev, jnp.max(s, axis=-1, keepdims=True))
        alpha = jnp.exp(m_prev - m_new)
        l_scr[...] = alpha * l_scr[...] + jnp.sum(jnp.exp(s - m_new),
                                                  axis=-1, keepdims=True)
        m_scr[...] = m_new

    @pl.when(j == nj - 1)
    def _finalize():
        lse_ref[...] = m_scr[...] + jnp.log(l_scr[...])


def _normalize(x, eps=1e-8):
    # NOTE: clamps each row norm (the reference clamps the product of norms);
    # identical for any non-degenerate input.
    x = x.astype(jnp.float32)
    norm = jnp.sqrt(jnp.sum(x * x, axis=-1, keepdims=True))
    return x / jnp.maximum(norm, eps)


def _round_up(x, m):
    return ((x + m - 1) // m) * m


def _pick_col_tile(n_pad):
    for t in (512, 384, 256, 128):
        if n_pad % t == 0:
            return t
    return 128  # unreachable: n_pad is a multiple of 128


def _pick_row_tile(n_pad):
    # Prefer an even number of row tiles (the row axis is "parallel" ->
    # sharded across v7x's two TensorCores); among those prefer the largest
    # tile for column-operand HBM reuse (matters on v5e/v6e bandwidth).
    for t in (512, 256, 128):
        if n_pad % t == 0 and (n_pad // t) % 2 == 0:
            return t
    for t in (512, 256, 128):
        if n_pad % t == 0:
            return t
    return 128


def ntxent_loss(z_i, z_j, temperature):
    """NT-Xent loss; z_i, z_j: (B, D).  Returns a scalar (f32)."""
    B, D = z_i.shape
    assert z_j.shape == (B, D)
    N = 2 * B
    inv_t = 1.0 / float(temperature)

    # O(N*D) prep in plain JAX (tiny vs. the O(N^2 * D) kernel work).
    zi = _normalize(z_i)
    zj = _normalize(z_j)
    zhat = jnp.concatenate([zi, zj], axis=0)               # (N, D) f32 unit rows
    zpos = jnp.concatenate([zj, zi], axis=0)               # partner of row r
    # Exact-f32 positive logit sim(r, r±B)/T, subtracted outside the kernel.
    positives = jnp.sum(zhat * zpos, axis=-1) * jnp.float32(inv_t)   # (N,)

    # Adaptive tiling: pad N to a multiple of 128, pick tiles that divide it.
    n_pad = _round_up(N, 128)
    tm = _pick_row_tile(n_pad)
    tn = _pick_col_tile(n_pad)
    chunk = 256 if tn % 256 == 0 else 128
    n_row = n_pad // tm
    n_col = n_pad // tn

    # Single shared bf16 operand for both sides of the similarity matmul.
    zhat_bf = zhat.astype(jnp.bfloat16)
    if n_pad != N:
        zhat_bf = jnp.pad(zhat_bf, ((0, n_pad - N), (0, 0)))

    kernel = functools.partial(
        _ntxent_lse_kernel, block_m=tm, block_n=tn, chunk=chunk,
        inv_temp=inv_t, n_valid=N, has_pad=(n_pad != N))

    # VMEM budget: double-buffered bf16 inputs + output block + scratch +
    # in-flight f32 similarity chunks; headroom below v7x's 64 MiB physical.
    # TODO(synk): for very large D on v7x, add a third grid axis blocking D.
    vmem_need = (2 * (tm + tn) * D * 2          # double-buffered bf16 inputs
                 + 2 * tm * 4                   # output block (double-buffered)
                 + 2 * tm * 4                   # m/l scratch
                 + 2 * tm * chunk * 4)          # in-flight f32 similarity chunks
    vmem_limit = int(min(48 * 1024 * 1024, max(32 * 1024 * 1024, 2 * vmem_need)))

    cost = pl.CostEstimate(
        flops=2 * n_pad * n_pad * D,
        transcendentals=n_pad * n_pad,
        # Column operand is re-read once per row tile.
        bytes_accessed=(n_pad * D + n_row * n_pad * D) * 2 + n_pad * 4)

    lse = pl.pallas_call(
        kernel,
        out_shape=jax.ShapeDtypeStruct((n_pad, 1), jnp.float32),
        grid_spec=pltpu.PrefetchScalarGridSpec(
            num_scalar_prefetch=0,
            grid=(n_row, n_col),
            in_specs=[
                pl.BlockSpec((tm, D), lambda i, j: (i, 0)),   # row operand tile
                pl.BlockSpec((tn, D), lambda i, j: (j, 0)),   # column operand tile
            ],
            out_specs=pl.BlockSpec((tm, 1), lambda i, j: (i, 0)),
            scratch_shapes=[
                pltpu.VMEM((tm, 1), jnp.float32),   # running max
                pltpu.VMEM((tm, 1), jnp.float32),   # running sum of exp
            ],
        ),
        compiler_params=pltpu.CompilerParams(
            dimension_semantics=("parallel", "arbitrary"),
            vmem_limit_bytes=vmem_limit),
        cost_estimate=cost,
    )(zhat_bf, zhat_bf)

    # Scalar reduction outside the kernel (row axis is parallel / sharded).
    return (jnp.sum(lse[:N, 0]) - jnp.sum(positives)) / jnp.float32(N)


def _ntxent_ref(z_i, z_j, temperature):
    # Pure-JAX f32 reference mirroring the PyTorch module.
    B = z_i.shape[0]
    N = 2 * B
    z = jnp.concatenate([z_i, z_j], axis=0).astype(jnp.float32)
    dots = z @ z.T
    norms = jnp.sqrt(jnp.sum(z * z, axis=-1, keepdims=True))
    sim = dots / jnp.maximum(norms * norms.T, 1e-8) / temperature
    ids = jnp.arange(N)
    pos_col = jnp.where(ids < B, ids + B, ids - B)
    positives = sim[ids, pos_col]
    offdiag = jnp.where(ids[:, None] == ids[None, :], -1e30, sim)
    lse = jax.scipy.special.logsumexp(offdiag, axis=-1)
    return jnp.sum(lse - positives) / N


if __name__ == "__main__":
    key = jax.random.PRNGKey(0)
    k1, k2, k3, k4, k5, k6 = jax.random.split(key, 6)
    temperature = 0.5

    # Small case (toy shapes of the original module): 1x1 grid, padded columns.
    z_i = jax.random.normal(k1, (4, 32), dtype=jnp.float32)
    z_j = jax.random.normal(k2, (4, 32), dtype=jnp.float32)
    loss = jax.block_until_ready(ntxent_loss(z_i, z_j, temperature))
    ref = _ntxent_ref(z_i, z_j, temperature)
    assert jnp.allclose(loss, ref, rtol=1e-2, atol=1e-2), (loss, ref)

    # N = 200 -> padded to 256: pad-column masking + 2 row tiles.
    z_i2 = jax.random.normal(k3, (100, 64), dtype=jnp.float32)
    z_j2 = jax.random.normal(k4, (100, 64), dtype=jnp.float32)
    loss2 = jax.block_until_ready(ntxent_loss(z_i2, z_j2, temperature))
    ref2 = _ntxent_ref(z_i2, z_j2, temperature)
    assert jnp.allclose(loss2, ref2, rtol=1e-2, atol=1e-2), (loss2, ref2)

    # N = 768 (no padding): 6x2 grid, online logsumexp across column tiles,
    # diagonal masking, 128-lane sub-chunking (tn = 384).
    z_i3 = jax.random.normal(k5, (384, 128), dtype=jnp.float32)
    z_j3 = jax.random.normal(k6, (384, 128), dtype=jnp.float32)
    loss3 = jax.block_until_ready(ntxent_loss(z_i3, z_j3, temperature))
    ref3 = _ntxent_ref(z_i3, z_j3, temperature)
    assert jnp.allclose(loss3, ref3, rtol=1e-2, atol=1e-2), (loss3, ref3)

    print("KERNEL_OK")
</pallas_src>

<mosaic_0001>
module attributes {stable_mosaic.version = 11 : i64} {
  func.func @_ntxent_lse_kernel(%arg0: i32, %arg1: i32, %arg2: memref<128x32xbf16, #tpu.memory_space<vmem>>, %arg3: memref<128x32xbf16, #tpu.memory_space<vmem>>, %arg4: memref<128x1xf32, #tpu.memory_space<vmem>>, %arg5: memref<128x1xf32, #tpu.memory_space<vmem>>, %arg6: memref<128x1xf32, #tpu.memory_space<vmem>>) attributes {dimension_semantics = [#tpu.dimension_semantics<parallel>, #tpu.dimension_semantics<arbitrary>], iteration_bounds = array<i64: 1, 1>, scalar_prefetch = 0 : i64, scratch_operands = 2 : i64, tpu.core_type = #tpu.core_type<tc>, window_params = [{transform_indices = @transform_0, window_bounds = array<i64: 128, 32>}, {transform_indices = @transform_1, window_bounds = array<i64: 128, 32>}, {transform_indices = @transform_2, window_bounds = array<i64: 128, 1>}]} {
    %c0_i32 = arith.constant 0 : i32
    %0 = arith.cmpi eq, %arg1, %c0_i32 : i32
    %1 = arith.extui %0 : i1 to i32
    %c0_i32_0 = arith.constant 0 : i32
    %2 = arith.cmpi ne, %1, %c0_i32_0 : i32
    scf.if %2 {
      %cst_20 = arith.constant -1.000000e+30 : f32
      %42 = vector.broadcast %cst_20 : f32 to vector<128x1xf32>
      %c0_21 = arith.constant 0 : index
      %c0_22 = arith.constant 0 : index
      %43 = vector.load %arg5[%c0_21, %c0_22] : memref<128x1xf32, #tpu.memory_space<vmem>>, vector<128x1xf32>
      tpu.vector_store %arg5[%c0_21, %c0_22], %42 {strides = array<i32>} : memref<128x1xf32, #tpu.memory_space<vmem>>, vector<128x1xf32>,
      %cst_23 = arith.constant 0.000000e+00 : f32
      %44 = vector.broadcast %cst_23 : f32 to vector<128x1xf32>
      %c0_24 = arith.constant 0 : index
      %c0_25 = arith.constant 0 : index
      %45 = vector.load %arg6[%c0_24, %c0_25] : memref<128x1xf32, #tpu.memory_space<vmem>>, vector<128x1xf32>
      tpu.vector_store %arg6[%c0_24, %c0_25], %44 {strides = array<i32>} : memref<128x1xf32, #tpu.memory_space<vmem>>, vector<128x1xf32>,
    } else {
    }
    %c128_i32 = arith.constant 128 : i32
    %3 = arith.muli %arg0, %c128_i32 : i32
    %c128_i32_1 = arith.constant 128 : i32
    %4 = arith.muli %arg1, %c128_i32_1 : i32
    %c0 = arith.constant 0 : index
    %c0_2 = arith.constant 0 : index
    %5 = vector.load %arg2[%c0, %c0_2] : memref<128x32xbf16, #tpu.memory_space<vmem>>, vector<128x32xbf16>
    %6 = tpu.iota {dimensions = array<i32: 0>} : vector<128x128xi32>
    %7 = vector.broadcast %3 : i32 to vector<128x128xi32>
    %8 = arith.addi %6, %7 : vector<128x128xi32>
    %c0_3 = arith.constant 0 : index
    %c0_4 = arith.constant 0 : index
    %9 = vector.load %arg3[%c0_3, %c0_4] : memref<128x32xbf16, #tpu.memory_space<vmem>>, vector<128x32xbf16>
    %cst = arith.constant dense<0.000000e+00> : vector<128x128xf32>
    %10 = tpu.matmul %5, %9, %cst {dimension_numbers = #tpu.dot_dimension_numbers<[1], [1], [0], [0], [0, 0, 1, 0], [], []>} : vector<128x32xbf16>, vector<128x32xbf16>, vector<128x128xf32> -> vector<128x128xf32>
    %cst_5 = arith.constant 2.000000e+00 : f32
    %11 = vector.broadcast %cst_5 : f32 to vector<128x128xf32>
    %12 = arith.mulf %10, %11 : vector<128x128xf32>
    %13 = tpu.iota {dimensions = array<i32: 1>} : vector<128x128xi32>
    %c0_i32_6 = arith.constant 0 : i32
    %14 = arith.addi %4, %c0_i32_6 : i32
    %15 = vector.broadcast %14 : i32 to vector<128x128xi32>
    %16 = arith.addi %13, %15 : vector<128x128xi32>
    %17 = arith.cmpi eq, %8, %16 : vector<128x128xi32>
    %c8_i32 = arith.constant 8 : i32
    %18 = vector.broadcast %c8_i32 : i32 to vector<128x128xi32>
    %19 = arith.cmpi sge, %16, %18 : vector<128x128xi32>
    %20 = arith.ori %17, %19 : vector<128x128xi1>
    %cst_7 = arith.constant -1.000000e+30 : f32
    %21 = vector.broadcast %cst_7 : f32 to vector<128x128xf32>
    %22 = arith.select %20, %21, %12 : vector<128x128xi1>, vector<128x128xf32>
    %c0_8 = arith.constant 0 : index
    %c0_9 = arith.constant 0 : index
    %23 = vector.load %arg5[%c0_8, %c0_9] : memref<128x1xf32, #tpu.memory_space<vmem>>, vector<128x1xf32>
    %cst_10 = arith.constant dense<0xFF800000> : vector<128xf32>
    %24 = vector.multi_reduction <maximumf>, %22, %cst_10 [1] : vector<128x128xf32> to vector<128xf32>
    %25 = vector.shape_cast %24 : vector<128xf32> to vector<128x1xf32>
    %26 = arith.maximumf %23, %25 : vector<128x1xf32>
    %27 = arith.subf %23, %26 : vector<128x1xf32>
    %28 = math.exp %27 : vector<128x1xf32>
    %c0_11 = arith.constant 0 : index
    %c0_12 = arith.constant 0 : index
    %29 = vector.load %arg6[%c0_11, %c0_12] : memref<128x1xf32, #tpu.memory_space<vmem>>, vector<128x1xf32>
    %30 = arith.mulf %28, %29 : vector<128x1xf32>
    %31 = vector.broadcast %26 : vector<128x1xf32> to vector<128x128xf32>
    %32 = arith.subf %22, %31 : vector<128x128xf32>
    %33 = math.exp %32 : vector<128x128xf32>
    %cst_13 = arith.constant dense<0.000000e+00> : vector<128xf32>
    %34 = vector.multi_reduction <add>, %33, %cst_13 [1] : vector<128x128xf32> to vector<128xf32>
    %35 = vector.shape_cast %34 : vector<128xf32> to vector<128x1xf32>
    %36 = arith.addf %30, %35 : vector<128x1xf32>
    %c0_14 = arith.constant 0 : index
    %c0_15 = arith.constant 0 : index
    %37 = vector.load %arg6[%c0_14, %c0_15] : memref<128x1xf32, #tpu.memory_space<vmem>>, vector<128x1xf32>
    tpu.vector_store %arg6[%c0_14, %c0_15], %36 {strides = array<i32>} : memref<128x1xf32, #tpu.memory_space<vmem>>, vector<128x1xf32>,
    %c0_16 = arith.constant 0 : index
    %c0_17 = arith.constant 0 : index
    %38 = vector.load %arg5[%c0_16, %c0_17] : memref<128x1xf32, #tpu.memory_space<vmem>>, vector<128x1xf32>
    tpu.vector_store %arg5[%c0_16, %c0_17], %26 {strides = array<i32>} : memref<128x1xf32, #tpu.memory_space<vmem>>, vector<128x1xf32>,
    %c0_i32_18 = arith.constant 0 : i32
    %39 = arith.cmpi eq, %arg1, %c0_i32_18 : i32
    %40 = arith.extui %39 : i1 to i32
    %c0_i32_19 = arith.constant 0 : i32
    %41 = arith.cmpi ne, %40, %c0_i32_19 : i32
    scf.if %41 {
      %c0_20 = arith.constant 0 : index
      %c0_21 = arith.constant 0 : index
      %42 = vector.load %arg5[%c0_20, %c0_21] : memref<128x1xf32, #tpu.memory_space<vmem>>, vector<128x1xf32>
      %c0_22 = arith.constant 0 : index
      %c0_23 = arith.constant 0 : index
      %43 = vector.load %arg6[%c0_22, %c0_23] : memref<128x1xf32, #tpu.memory_space<vmem>>, vector<128x1xf32>
      %44 = math.log %43 : vector<128x1xf32>
      %45 = arith.addf %42, %44 : vector<128x1xf32>
      %c0_24 = arith.constant 0 : index
      %c0_25 = arith.constant 0 : index
      %46 = vector.load %arg4[%c0_24, %c0_25] : memref<128x1xf32, #tpu.memory_space<vmem>>, vector<128x1xf32>
      tpu.vector_store %arg4[%c0_24, %c0_25], %45 {strides = array<i32>} : memref<128x1xf32, #tpu.memory_space<vmem>>, vector<128x1xf32>,
    } else {
    }
    return
  }
  func.func @transform_0(%arg0: i32, %arg1: i32) -> (i32, i32) {
    %c0_i32 = arith.constant 0 : i32
    %c0_i32_0 = arith.constant 0 : i32
    return %arg0, %c0_i32 : i32, i32
  }
  func.func @transform_1(%arg0: i32, %arg1: i32) -> (i32, i32) {
    %c0_i32 = arith.constant 0 : i32
    %c0_i32_0 = arith.constant 0 : i32
    return %arg1, %c0_i32 : i32, i32
  }
  func.func @transform_2(%arg0: i32, %arg1: i32) -> (i32, i32) {
    %c0_i32 = arith.constant 0 : i32
    %c0_i32_0 = arith.constant 0 : i32
    return %arg0, %c0_i32 : i32, i32
  }
}

</mosaic_0001>

<bundles_post_ra>
// kernel: tpu_custom_call.1
= control target key start
LH: loop header
LB: loop body
LE: loop exit
PB: predicated region body
PF: predicated region fallthrough
CT: control target
= control target key end

     0   :  { %vm197_vm0 = vcmask 261120   ;;  %vm16_vm1 = vcmask 7168   ;;  %v1089_v24 = vmov -1e+30   ;;  %v67_v25 = vlaneseq  ;;  %s1664_s1 = inlined_call_operand.vmem [shape: bf16[128,32], index: 1, kind: input, shape index: {}]   ;;  %s1665_s0 = inlined_call_operand.vmem [shape: bf16[128,32], index: 0, kind: input, shape index: {}]   ;;  %s1666_s2 = inlined_call_operand.vmem [shape: f32[128,1], index: 2, kind: output, shape index: {}]  }
   0x1   :  { %v977_v0 = vld [vmem:[%s1664_s1 + $0x38] sm:$0xff]   ;;  %v978_v1 = vld [vmem:[%s1664_s1 + $0x30] sm:$0xff]   ;;  %v979_v3 = vld [vmem:[%s1664_s1 + $0x28] sm:$0xff]   ;;  %27 = vst.msk [vmem:[#allocation2 + $0x50] sm:$0xff] %vm16_vm1, %v1089_v24 }
   0x2   :  { %956 = vmatprep.subr.msk.bf16.mxu0 %vm197_vm0, %v977_v0  ;;  %957 = vmatprep.subr.msk.bf16.mxu1 %vm197_vm0, %v977_v0  ;;  %v244_v2 = vsel %vm197_vm0, %v977_v0, 0  ;;  %v241_v4 = vsel %vm197_vm0, %v978_v1, 0  ;;  %v985_v5 = vld [vmem:[%s1665_s0] sm:$0xff]   ;;  %v238_v7 = vsel %vm197_vm0, %v979_v3, 0  ;;  %v981_v10 = vld [vmem:[%s1664_s1 + $0x18] sm:$0xff]   ;;  %v982_v12 = vld [vmem:[%s1664_s1 + $0x10] sm:$0xff]  }
   0x3   :  { %909 = vmatpush3.bf16.xpose.msra.mxu0 %v244_v2  ;;  %948 = vmatpush3.bf16.xpose.msra.mxu1 %v244_v2  ;;  %v986_v6 = vld [vmem:[%s1665_s0 + $0x20] sm:$0xff]   ;;  %v232_v11 = vsel %vm197_vm0, %v981_v10, 0  ;;  %v229_v13 = vsel %vm197_vm0, %v982_v12, 0  ;;  %v983_v14 = vld [vmem:[%s1664_s1 + $0x8] sm:$0xff]   ;;  %v989_v20 = vld [vmem:[%s1665_s0 + $0x10] sm:$0xff]   ;;  %17 = vst.msk [vmem:[#allocation2] sm:$0xff] %vm16_vm1, %v1089_v24 }
   0x4   :  { %958 = vmatprep.subr.msk.bf16.mxu0 %vm197_vm0, %v978_v1  ;;  %959 = vmatprep.subr.msk.bf16.mxu1 %vm197_vm0, %v978_v1  ;;  %v980_v8 = vld [vmem:[%s1664_s1 + $0x20] sm:$0xff]   ;;  %v226_v15 = vsel %vm197_vm0, %v983_v14, 0  ;;  %v987_v18 = vld [vmem:[%s1665_s0 + $0x8] sm:$0xff]   ;;  %v991_v21 = vld [vmem:[%s1665_s0 + $0x30] sm:$0xff]   ;;  %18 = vst.msk [vmem:[#allocation2 + $0x8] sm:$0xff] %vm16_vm1, %v1089_v24  ;;  %v1203_v26 = vshrl.u32 %v67_v25, 7 }
   0x5   :  { %924 = vmatprep.mubr.msk.bf16.mxu0 %vm197_vm0, %v985_v5  ;;  %932 = vmatprep.mubr.msk.bf16.mxu1 %vm197_vm0, %v986_v6  ;;  %v235_v9 = vsel %vm197_vm0, %v980_v8, 0  ;;  %v984_v16 = vld [vmem:[%s1664_s1] sm:$0xff]   ;;  %v988_v19 = vld [vmem:[%s1665_s0 + $0x28] sm:$0xff]   ;;  %v990_v22 = vld [vmem:[%s1665_s0 + $0x18] sm:$0xff]   ;;  %19 = vst.msk [vmem:[#allocation2 + $0x10] sm:$0xff] %vm16_vm1, %v1089_v24  ;;  %v1206_v28 = vand.u32 127, %v67_v25 }
   0x6   :  { %v223_v17 = vsel %vm197_vm0, %v984_v16, 0  ;;  %v992_v23 = vld [vmem:[%s1665_s0 + $0x38] sm:$0xff]   ;;  %20 = vst.msk [vmem:[#allocation2 + $0x18] sm:$0xff] %vm16_vm1, %v1089_v24  ;;  %21 = vst.msk [vmem:[#allocation2 + $0x20] sm:$0xff] %vm16_vm1, %v1089_v24  ;;  %v78_v27 = vadd.s32 80, %v1203_v26  ;;  %v70_v29 = vadd.s32 16, %v1203_v26 }
   0x7   :  { %22 = vst.msk [vmem:[#allocation2 + $0x28] sm:$0xff] %vm16_vm1, %v1089_v24  ;;  %23 = vst.msk [vmem:[#allocation2 + $0x30] sm:$0xff] %vm16_vm1, %v1089_v24  ;;  %vm379_vm3 = vcmp.ge.s32.totalorder %v1206_v28, 8  ;;  %v71_v30 = vadd.s32 24, %v1203_v26  ;;  %vm363_vm7 = vcmp.eq.s32.totalorder %v1203_v26, %v1206_v28  ;;  %v76_v33 = vadd.s32 64, %v1203_v26 }
   0x8   :  { %24 = vst.msk [vmem:[#allocation2 + $0x38] sm:$0xff] %vm16_vm1, %v1089_v24  ;;  %25 = vst.msk [vmem:[#allocation2 + $0x40] sm:$0xff] %vm16_vm1, %v1089_v24  ;;  %vm373_vm2 = vcmp.eq.s32.totalorder %v78_v27, %v1206_v28  ;;  %vm365_vm4 = vcmp.eq.s32.totalorder %v70_v29, %v1206_v28  ;;  %v79_v36 = vadd.s32 88, %v1203_v26  ;;  %v77_v45 = vadd.s32 72, %v1203_v26 }
   0x9   :  { %26 = vst.msk [vmem:[#allocation2 + $0x48] sm:$0xff] %vm16_vm1, %v1089_v24  ;;  %28 = vst.msk [vmem:[#allocation2 + $0x58] sm:$0xff] %vm16_vm1, %v1089_v24  ;;  %vm366_vm8 = vcmp.eq.s32.totalorder %v71_v30, %v1206_v28  ;;  %vm371_vm11 = vcmp.eq.s32.totalorder %v76_v33, %v1206_v28  ;;  %v69_v47 = vadd.s32 8, %v1203_v26  ;;  %v74_v50 = vadd.s32 48, %v1203_v26  ;;  %v1360_v33 = vld [vmem:[#allocation2 + $0x50] sm:$0xff] }
   0xa   :  { %29 = vst.msk [vmem:[#allocation2 + $0x60] sm:$0xff] %vm16_vm1, %v1089_v24  ;;  %30 = vst.msk [vmem:[#allocation2 + $0x68] sm:$0xff] %vm16_vm1, %v1089_v24  ;;  %vm374_vm12 = vcmp.eq.s32.totalorder %v79_v36, %v1206_v28  ;;  %v75_v51 = vadd.s32 56, %v1203_v26  ;;  %vm372_vm15 = vcmp.eq.s32.totalorder %v77_v45, %v1206_v28  ;;  %v72_v61 = vadd.s32 32, %v1203_v26 }
   0xb   :  { %911 = vmatpush3.bf16.xpose.msra.mxu0 %v241_v4  ;;  %949 = vmatpush3.bf16.xpose.msra.mxu1 %v241_v4  ;;  %31 = vst.msk [vmem:[#allocation2 + $0x70] sm:$0xff] %vm16_vm1, %v1089_v24  ;;  %32 = vst.msk [vmem:[#allocation2 + $0x78] sm:$0xff] %vm16_vm1, %v1089_v24  ;;  %v83_v62 = vadd.s32 120, %v1203_v26  ;;  %v1091_v30 = vmov 0.0  }
   0xc   :  { %960 = vmatprep.subr.msk.bf16.mxu0 %vm197_vm0, %v979_v3  ;;  %961 = vmatprep.subr.msk.bf16.mxu1 %vm197_vm0, %v979_v3  ;;  %vm390_vm5 = vmor %vm373_vm2, %vm379_vm3  ;;  %vm369_vm2 = vcmp.eq.s32.totalorder %v74_v50, %v1206_v28  ;;  %35 = vst.msk [vmem:[#allocation3 + $0x10] sm:$0xff] %vm16_vm1, %v1091_v30 }
   0xd   :  { %vm382_vm6 = vmor %vm365_vm4, %vm379_vm3  ;;  %vm370_vm4 = vcmp.eq.s32.totalorder %v75_v51, %v1206_v28  ;;  %33 = vst.msk [vmem:[#allocation3] sm:$0xff] %vm16_vm1, %v1091_v30 }
   0xe   :  { %vm1228_vm9 = vmor %vm363_vm7, %vm379_vm3  ;;  %34 = vst.msk [vmem:[#allocation3 + $0x8] sm:$0xff] %vm16_vm1, %v1091_v30 }
   0xf   :  { %vm383_vm10 = vmor %vm366_vm8, %vm379_vm3  ;;  %36 = vst.msk [vmem:[#allocation3 + $0x18] sm:$0xff] %vm16_vm1, %v1091_v30 }
  0x10   :  { %vm1250_vm13 = vmor %vm371_vm11, %vm379_vm3  ;;  %37 = vst.msk [vmem:[#allocation3 + $0x20] sm:$0xff] %vm16_vm1, %v1091_v30 }
  0x11   :  { %vm391_vm14 = vmor %vm374_vm12, %vm379_vm3  ;;  %38 = vst.msk [vmem:[#allocation3 + $0x28] sm:$0xff] %vm16_vm1, %v1091_v30  ;;  %v1468_v29 = vld [vmem:[#allocation2 + $0x60] sm:$0xff] }
  0x12   :  { %vm386_vm7 = vmor %vm369_vm2, %vm379_vm3  ;;  %39 = vst.msk [vmem:[#allocation3 + $0x30] sm:$0xff] %vm16_vm1, %v1091_v30 }
  0x13   :  { %913 = vmatpush3.bf16.xpose.msra.mxu0 %v238_v7  ;;  %950 = vmatpush3.bf16.xpose.msra.mxu1 %v238_v7  ;;  %vm387_vm8 = vmor %vm370_vm4, %vm379_vm3  ;;  %40 = vst.msk [vmem:[#allocation3 + $0x38] sm:$0xff] %vm16_vm1, %v1091_v30 }
  0x14   :  { %962 = vmatprep.subr.msk.bf16.mxu0 %vm197_vm0, %v980_v8  ;;  %963 = vmatprep.subr.msk.bf16.mxu1 %vm197_vm0, %v980_v8  ;;  %41 = vst.msk [vmem:[#allocation3 + $0x40] sm:$0xff] %vm16_vm1, %v1091_v30  ;;  %42 = vst.msk [vmem:[#allocation3 + $0x48] sm:$0xff] %vm16_vm1, %v1091_v30 }
  0x15   :  { %43 = vst.msk [vmem:[#allocation3 + $0x50] sm:$0xff] %vm16_vm1, %v1091_v30  ;;  %44 = vst.msk [vmem:[#allocation3 + $0x58] sm:$0xff] %vm16_vm1, %v1091_v30 }
  0x16   :  { %45 = vst.msk [vmem:[#allocation3 + $0x60] sm:$0xff] %vm16_vm1, %v1091_v30  ;;  %46 = vst.msk [vmem:[#allocation3 + $0x68] sm:$0xff] %vm16_vm1, %v1091_v30 }
  0x17   :  { %47 = vst.msk [vmem:[#allocation3 + $0x70] sm:$0xff] %vm16_vm1, %v1091_v30  ;;  %48 = vst.msk [vmem:[#allocation3 + $0x78] sm:$0xff] %vm16_vm1, %v1091_v30  ;;  %v1470_v30 = vld [vmem:[#allocation2 + $0x28] sm:$0xff] }
  0x1b   :  { %915 = vmatpush3.bf16.xpose.msra.mxu0 %v235_v9  ;;  %951 = vmatpush3.bf16.xpose.msra.mxu1 %v235_v9  ;;  %v80_v9 = vadd.s32 96, %v1203_v26 }
  0x1c   :  { %964 = vmatprep.subr.msk.bf16.mxu0 %vm197_vm0, %v981_v10  ;;  %965 = vmatprep.subr.msk.bf16.mxu1 %vm197_vm0, %v981_v10  ;;  %v73_v10 = vadd.s32 40, %v1203_v26 }
  0x23   :  { %917 = vmatpush3.bf16.xpose.msra.mxu0 %v232_v11  ;;  %952 = vmatpush3.bf16.xpose.msra.mxu1 %v232_v11 }
  0x24   :  { %966 = vmatprep.subr.msk.bf16.mxu0 %vm197_vm0, %v982_v12  ;;  %967 = vmatprep.subr.msk.bf16.mxu1 %vm197_vm0, %v982_v12 }
  0x2b   :  { %919 = vmatpush3.bf16.xpose.msra.mxu0 %v229_v13  ;;  %953 = vmatpush3.bf16.xpose.msra.mxu1 %v229_v13 }
  0x2c   :  { %968 = vmatprep.subr.msk.bf16.mxu0 %vm197_vm0, %v983_v14  ;;  %969 = vmatprep.subr.msk.bf16.mxu1 %vm197_vm0, %v983_v14 }
  0x33   :  { %921 = vmatpush3.bf16.xpose.msra.mxu0 %v226_v15  ;;  %954 = vmatpush3.bf16.xpose.msra.mxu1 %v226_v15  ;;  %v1090_v15 = vmov 0  }
  0x34   :  { %970 = vmatprep.subr.msk.bf16.mxu0 %vm197_vm0, %v984_v16  ;;  %971 = vmatprep.subr.msk.bf16.mxu1 %vm197_vm0, %v984_v16 }
  0x35   :  { %975 = vset.pattern.permute.xlu1 %v1090_v15  ;;  %976 = vset.pattern.permute.xlu0 %v1090_v15 }
  0x3b   :  { %923 = vmatpush3.bf16.xpose.msra.mxu0 %v223_v17  ;;  %955 = vmatpush3.bf16.xpose.msra.mxu1 %v223_v17  ;;  %v82_v17 = vadd.s32 112, %v1203_v26 }
  0x3d   :  { %vm377_vm2 = vcmp.eq.s32.totalorder %v82_v17, %v1206_v28  ;;  %v1451_v17 = vld [vmem:[#allocation2 + $0x78] sm:$0xff] }
  0x42   :  { %925 = vmatmul.mubr.msk.bf16.vlgmr.msra.gmra.mxu0 %vm197_vm0, %v987_v18  ;;  %933 = vmatmul.mubr.msk.bf16.vlgmr.msra.gmra.mxu1 %vm197_vm0, %v988_v19 }
  0x43   :  { %928 = vmatprep.mubr.msk.bf16.mxu0 %vm197_vm0, %v989_v20  ;;  %936 = vmatprep.mubr.msk.bf16.mxu1 %vm197_vm0, %v991_v21  ;;  %v81_v21 = vadd.s32 104, %v1203_v26 }
  0x45   :  { %vm376_vm4 = vcmp.eq.s32.totalorder %v81_v21, %v1206_v28 }
  0x4a   :  { %929 = vmatmul.mubr.msk.bf16.gmra.mxu0 %vm197_vm0, %v990_v22  ;;  %937 = vmatmul.mubr.msk.bf16.gmra.mxu1 %vm197_vm0, %v992_v23  ;;  %vm364_vm0 = vcmp.eq.s32.totalorder %v69_v47, %v1206_v28 }
 0x102   :  { %v926_v31 = vpop.f32.mrf.mxu0  ;;  %v934_v32 = vpop.f32.mrf.mxu1 }
 0x103   :  { %v345_v34 = vmul.f32 2.0, %v926_v31  ;;  %v353_v35 = vmul.f32 2.0, %v934_v32 }
 0x104   :  { %v280_v37 = vpop.f32.mrf.mxu0  ;;  %v312_v38 = vpop.f32.mrf.mxu1 }
 0x105   :  { %v343_v39 = vmul.f32 2.0, %v280_v37  ;;  %v1222_v40 = vsel %vm390_vm5, -1e+30, %v353_v35  ;;  %v1224_v41 = vsel %vm382_vm6, -1e+30, %v345_v34  ;;  %v351_v52 = vmul.f32 2.0, %v312_v38  ;;  %vm389_vm5 = vmor %vm372_vm15, %vm379_vm3 }
 0x106   :  { %448 = vmax.xlane.f32.xlu0 %v1222_v40  ;;  %v935_v43 = vpop.f32.mrf.mxu1  ;;  %432 = vmax.xlane.f32.xlu1 %v1224_v41  ;;  %v927_v44 = vpop.f32.mrf.mxu0  ;;  %vm381_vm6 = vmor %vm364_vm0, %vm379_vm3  ;;  %v1362_v34 = vld [vmem:[#allocation2 + $0x10] sm:$0xff]  ;;  %v1370_v38 = vld [vmem:[#allocation2] sm:$0xff] }
 0x107   :  { %v346_v46 = vmul.f32 2.0, %v927_v44  ;;  %v354_v53 = vmul.f32 2.0, %v935_v43  ;;  %v1244_v54 = vsel %vm1228_vm9, -1e+30, %v343_v39  ;;  %v1266_v1 = vsel %vm1250_vm13, -1e+30, %v351_v52 }
 0x108   :  { %v283_v48 = vpop.f32.mrf.mxu0  ;;  %v315_v49 = vpop.f32.mrf.mxu1  ;;  %vm367_vm9 = vcmp.eq.s32.totalorder %v72_v61, %v1206_v28  ;;  %vm375_vm13 = vcmp.eq.s32.totalorder %v80_v9, %v1206_v28  ;;  %v1372_v39 = vld [vmem:[#allocation2 + $0x18] sm:$0xff] }
 0x109   :  { %v1246_v55 = vsel %vm383_vm10, -1e+30, %v346_v46  ;;  %v344_v63 = vmul.f32 2.0, %v283_v48  ;;  %v352_v0 = vmul.f32 2.0, %v315_v49  ;;  %v1268_v2 = vsel %vm391_vm14, -1e+30, %v354_v53  ;;  %vm384_vm11 = vmor %vm367_vm9, %vm379_vm3 }
 0x10a   :  { %428 = vmax.xlane.f32.xlu0 %v1244_v54  ;;  %434 = vmax.xlane.f32.xlu1 %v1246_v55  ;;  %v930_v57 = vpop.f32.mrf.mxu0  ;;  %v938_v58 = vpop.f32.mrf.mxu1  ;;  %vm378_vm10 = vcmp.eq.s32.totalorder %v83_v62, %v1206_v28  ;;  %vm368_vm14 = vcmp.eq.s32.totalorder %v73_v10, %v1206_v28  ;;  %vm392_vm15 = vmor %vm375_vm13, %vm379_vm3  ;;  %v1389_v48 = vld [vmem:[#allocation2 + $0x40] sm:$0xff]  ;;  %v1391_v49 = vld [vmem:[#allocation2 + $0x58] sm:$0xff] }
 0x10b   :  { %v349_v4 = vmul.f32 2.0, %v930_v57  ;;  %v1285_v7 = vsel %vm389_vm5, -1e+30, %v352_v0  ;;  %v1287_v8 = vsel %vm381_vm6, -1e+30, %v344_v63  ;;  %vm395_vm12 = vmor %vm378_vm10, %vm379_vm3  ;;  %v357_v25 = vmul.f32 2.0, %v938_v58 }
 0x10c   :  { %v296_v59 = vpop.f32.mrf.mxu0  ;;  %v328_v60 = vpop.f32.mrf.mxu1  ;;  %vm385_vm0 = vmor %vm368_vm14, %vm379_vm3  ;;  %v1409_v58 = vld [vmem:[#allocation2 + $0x48] sm:$0xff] }
 0x10d   :  { %v347_v11 = vmul.f32 2.0, %v296_v59  ;;  %v1294_v13 = vsel %vm386_vm7, -1e+30, %v349_v4  ;;  %v355_v18 = vmul.f32 2.0, %v328_v60  ;;  %vm1326_vm5 = vmor %vm377_vm2, %vm379_vm3  ;;  %v1411_v59 = vld [vmem:[#allocation2 + $0x8] sm:$0xff]  ;;  %v1429_v4 = vld [vmem:[#allocation2 + $0x30] sm:$0xff] }
 0x10e   :  { %444 = vmax.xlane.f32.xlu0 %v1266_v1  ;;  %450 = vmax.xlane.f32.xlu1 %v1268_v2  ;;  %v931_v3 = vpop.f32.mrf.mxu0  ;;  %v939_v6 = vpop.f32.mrf.mxu1  ;;  %vm393_vm6 = vmor %vm376_vm4, %vm379_vm3  ;;  %v1354_v31 = vsel %vm1326_vm5, -1e+30, %v357_v25 }
 0x10f   :  { %v350_v5 = vmul.f32 2.0, %v931_v3  ;;  %v358_v12 = vmul.f32 2.0, %v939_v6  ;;  %v1307_v19 = vsel %vm384_vm11, -1e+30, %v347_v11  ;;  %v1319_v24 = vsel %vm392_vm15, -1e+30, %v355_v18 }
 0x110   :  { %v299_v16 = vpop.f32.mrf.mxu0  ;;  %v331_v23 = vpop.f32.mrf.mxu1 }
 0x111   :  { %v1296_v14 = vsel %vm387_vm8, -1e+30, %v350_v5  ;;  %v1309_v20 = vsel %vm395_vm12, -1e+30, %v358_v12  ;;  %v348_v22 = vmul.f32 2.0, %v299_v16  ;;  %v356_v26 = vmul.f32 2.0, %v331_v23 }
 0x112   :  { %446 = vmax.xlane.f32.xlu1 %v1285_v7  ;;  %430 = vmax.xlane.f32.xlu0 %v1287_v8  ;;  %v1431_v5 = vld [vmem:[#allocation2 + $0x38] sm:$0xff]  ;;  %v1449_v16 = vld [vmem:[#allocation2 + $0x20] sm:$0xff] }
 0x113   :  { %v1322_v27 = vsel %vm385_vm0, -1e+30, %v348_v22  ;;  %v1356_v32 = vsel %vm393_vm6, -1e+30, %v356_v26 }
 0x116   :  { %440 = vmax.xlane.f32.xlu0 %v1294_v13  ;;  %442 = vmax.xlane.f32.xlu1 %v1296_v14 }
 0x11a   :  { %436 = vmax.xlane.f32.xlu0 %v1307_v19  ;;  %458 = vmax.xlane.f32.xlu1 %v1309_v20 }
 0x11e   :  { %452 = vmax.xlane.f32.xlu0 %v1319_v24  ;;  %438 = vmax.xlane.f32.xlu1 %v1322_v27 }
 0x122   :  { %456 = vmax.xlane.f32.xlu0 %v1354_v31  ;;  %454 = vmax.xlane.f32.xlu1 %v1356_v32 }
 0x18f   :  { %v449_v35 = vpop.xlane.xlu0 %448  ;;  %v433_v36 = vpop.xlane.xlu1 %432 }
 0x190   :  { %v1365_v37 = vmax.f32 %v1360_v33, %v449_v35  ;;  %v1368_v28 = vmax.f32 %v1362_v34, %v433_v36 }
 0x192   :  { %759 = vst.msk [vmem:[#allocation2 + $0x50] sm:$0xff] %vm16_vm1, %v1365_v37  ;;  %v478_v43 = vsub.f32 %v1362_v34, %v1368_v28  ;;  %751 = vst.msk [vmem:[#allocation2 + $0x10] sm:$0xff] %vm16_vm1, %v1368_v28  ;;  %568 = vperm.xlu1 %975, %v1368_v28  }
 0x193   :  { %v429_v44 = vpop.xlane.xlu0 %428  ;;  %v435_v45 = vpop.xlane.xlu1 %434 }
 0x194   :  { %v1384_v46 = vmax.f32 %v1370_v38, %v429_v44  ;;  %v1387_v47 = vmax.f32 %v1372_v39, %v435_v45 }
 0x196   :  { %v476_v50 = vsub.f32 %v1370_v38, %v1384_v46  ;;  %749 = vst.msk [vmem:[#allocation2] sm:$0xff] %vm16_vm1, %v1384_v46  ;;  %752 = vst.msk [vmem:[#allocation2 + $0x18] sm:$0xff] %vm16_vm1, %v1387_v47  ;;  %558 = vperm.xlu0 %976, %v1384_v46   ;;  %608 = vperm.xlu1 %975, %v1365_v37   ;;  %v526_v46 = vld [vmem:[#allocation3 + $0x10] sm:$0xff] }
 0x197   :  { %v445_v52 = vpop.xlane.xlu0 %444  ;;  %v451_v53 = vpop.xlane.xlu1 %450 }
 0x198   :  { %v1404_v56 = vmax.f32 %v1389_v48, %v445_v52  ;;  %v1407_v57 = vmax.f32 %v1391_v49, %v451_v53 }
 0x19a   :  { %757 = vst.msk [vmem:[#allocation2 + $0x40] sm:$0xff] %vm16_vm1, %v1404_v56  ;;  %760 = vst.msk [vmem:[#allocation2 + $0x58] sm:$0xff] %vm16_vm1, %v1407_v57  ;;  %613 = vperm.xlu0 %976, %v1407_v57   ;;  %598 = vperm.xlu1 %975, %v1404_v56  }
 0x19b   :  { %v447_v62 = vpop.xlane.xlu1 %446  ;;  %v431_v63 = vpop.xlane.xlu0 %430 }
 0x19c   :  { %v1424_v0 = vmax.f32 %v1409_v58, %v447_v62  ;;  %v1427_v3 = vmax.f32 %v1411_v59, %v431_v63  ;;  %v1487_v62 = vld [vmem:[#allocation2 + $0x70] sm:$0xff]  ;;  %v1489_v63 = vld [vmem:[#allocation2 + $0x68] sm:$0xff] }
 0x19e   :  { %758 = vst.msk [vmem:[#allocation2 + $0x48] sm:$0xff] %vm16_vm1, %v1424_v0  ;;  %750 = vst.msk [vmem:[#allocation2 + $0x8] sm:$0xff] %vm16_vm1, %v1427_v3  ;;  %603 = vperm.xlu0 %976, %v1424_v0   ;;  %573 = vperm.xlu1 %975, %v1387_v47   ;;  %v1676_v28 = vsub.f32 %v1411_v59, %v1427_v3 }
 0x19f   :  { %v441_v10 = vpop.xlane.xlu0 %440  ;;  %v443_v11 = vpop.xlane.xlu1 %442 }
 0x1a0   :  { %v1444_v12 = vmax.f32 %v1429_v4, %v441_v10  ;;  %v1447_v15 = vmax.f32 %v1431_v5, %v443_v11  ;;  %v494_v38 = vmul.f32 1.442695, %v1676_v28  ;;  %v533_v28 = vld [vmem:[#allocation3 + $0x48] sm:$0xff] }
 0x1a2   :  { %755 = vst.msk [vmem:[#allocation2 + $0x30] sm:$0xff] %vm16_vm1, %v1444_v12  ;;  %756 = vst.msk [vmem:[#allocation2 + $0x38] sm:$0xff] %vm16_vm1, %v1447_v15  ;;  %563 = vperm.xlu1 %975, %v1427_v3  }
 0x1a3   :  { %v437_v22 = vpop.xlane.xlu0 %436  ;;  %v459_v23 = vpop.xlane.xlu1 %458 }
 0x1a4   :  { %v1463_v25 = vmax.f32 %v1449_v16, %v437_v22  ;;  %v1466_v26 = vmax.f32 %v1451_v17, %v459_v23 }
 0x1a6   :  { %753 = vst.msk [vmem:[#allocation2 + $0x20] sm:$0xff] %vm16_vm1, %v1463_v25  ;;  %764 = vst.msk [vmem:[#allocation2 + $0x78] sm:$0xff] %vm16_vm1, %v1466_v26  ;;  %588 = vperm.xlu1 %975, %v1444_v12  }
 0x1a7   :  { %v453_v44 = vpop.xlane.xlu0 %452  ;;  %v439_v45 = vpop.xlane.xlu1 %438 }
 0x1a8   :  { %v1482_v52 = vmax.f32 %v1468_v29, %v453_v44  ;;  %v1485_v53 = vmax.f32 %v1470_v30, %v439_v45 }
 0x1aa   :  { %761 = vst.msk [vmem:[#allocation2 + $0x60] sm:$0xff] %vm16_vm1, %v1482_v52  ;;  %754 = vst.msk [vmem:[#allocation2 + $0x28] sm:$0xff] %vm16_vm1, %v1485_v53  ;;  %578 = vperm.xlu1 %975, %v1463_v25  }
 0x1ab   :  { %v457_v22 = vpop.xlane.xlu0 %456  ;;  %v455_v23 = vpop.xlane.xlu1 %454 }
 0x1ac   :  { %v1501_v44 = vmax.f32 %v1487_v62, %v457_v22  ;;  %v1504_v45 = vmax.f32 %v1489_v63, %v455_v23 }
 0x1ae   :  { %763 = vst.msk [vmem:[#allocation2 + $0x70] sm:$0xff] %vm16_vm1, %v1501_v44  ;;  %762 = vst.msk [vmem:[#allocation2 + $0x68] sm:$0xff] %vm16_vm1, %v1504_v45  ;;  %618 = vperm.xlu1 %975, %v1482_v52   ;;  %623 = vperm.xlu0 %976, %v1504_v45  }
 0x1b2   :  { %593 = vperm.xlu1 %975, %v1447_v15   ;;  %633 = vperm.xlu0 %976, %v1466_v26  }
 0x1b6   :  { %583 = vperm.xlu1 %975, %v1485_v53  }
 0x1ba   :  { %628 = vperm.xlu1 %975, %v1501_v44  }
 0x20d   :  { %v569_v22 = vpop.permute.xlu1 %568 }
 0x20e   :  { %v638_v23 = vsub.f32 %v1224_v41, %v569_v22 }
 0x210   :  { %v656_v36 = vmul.f32 1.442695, %v638_v23 }
 0x211   :  { %v559_v11 = vpop.permute.xlu0 %558  ;;  %v609_v21 = vpop.permute.xlu1 %608 }
 0x212   :  { %993 = vpow2.f32 %v656_v36  ;;  %v636_v10 = vsub.f32 %v1244_v54, %v559_v11  ;;  %v646_v35 = vsub.f32 %v1222_v40, %v609_v21 }
 0x214   :  { %v652_v6 = vmul.f32 1.442695, %v636_v10  ;;  %v672_v18 = vmul.f32 1.442695, %v646_v35 }
 0x215   :  { %v599_v61 = vpop.permute.xlu1 %598  ;;  %v614_v9 = vpop.permute.xlu0 %613 }
 0x216   :  { %995 = vpow2.f32 %v652_v6  ;;  %v644_v51 = vsub.f32 %v1266_v1, %v599_v61  ;;  %v647_v22 = vsub.f32 %v1268_v2, %v614_v9 }
 0x217   :  { %997 = vpow2.f32 %v672_v18 }
 0x218   :  { %v668_v60 = vmul.f32 1.442695, %v644_v51  ;;  %v674_v35 = vmul.f32 1.442695, %v647_v22 }
 0x219   :  { %v574_v42 = vpop.permute.xlu1 %573  ;;  %v604_v36 = vpop.permute.xlu0 %603 }
 0x21a   :  { %v639_v41 = vsub.f32 %v1246_v55, %v574_v42  ;;  %999 = vpow2.f32 %v668_v60  ;;  %v645_v6 = vsub.f32 %v1285_v7, %v604_v36 }
 0x21c   :  { %v658_v23 = vmul.f32 1.442695, %v639_v41  ;;  %v670_v2 = vmul.f32 1.442695, %v645_v6 }
 0x21d   :  { %v564_v54 = vpop.permute.xlu1 %563 }
 0x21e   :  { %v637_v40 = vsub.f32 %v1287_v8, %v564_v54  ;;  %1001 = vpow2.f32 %v658_v23 }
 0x21f   :  { %v994_v21 = vpop.eup %993 }
 0x220   :  { %v654_v10 = vmul.f32 1.442695, %v637_v40  ;;  %688 = vadd.xlane.f32.xlu0 %v994_v21 }
 0x221   :  { %v589_v1 = vpop.permute.xlu1 %588 }
 0x222   :  { %1003 = vpow2.f32 %v654_v10  ;;  %v642_v51 = vsub.f32 %v1294_v13, %v589_v1 }
 0x223   :  { %v996_v55 = vpop.eup %995  ;;  %1005 = vpow2.f32 %v674_v35 }
 0x224   :  { %v998_v42 = vpop.eup %997  ;;  %v664_v60 = vmul.f32 1.442695, %v642_v51  ;;  %684 = vadd.xlane.f32.xlu1 %v996_v55 }
 0x225   :  { %704 = vadd.xlane.f32.xlu0 %v998_v42  ;;  %v579_v61 = vpop.permute.xlu1 %578 }
 0x226   :  { %1007 = vpow2.f32 %v664_v60  ;;  %v640_v8 = vsub.f32 %v1307_v19, %v579_v61 }
 0x227   :  { %1009 = vpow2.f32 %v670_v2  ;;  %v1000_v7 = vpop.eup %999 }
 0x228   :  { %v660_v9 = vmul.f32 1.442695, %v640_v8 }
 0x229   :  { %700 = vadd.xlane.f32.xlu0 %v1000_v7  ;;  %v619_v18 = vpop.permute.xlu1 %618  ;;  %v624_v36 = vpop.permute.xlu0 %623 }
 0x22a   :  { %1011 = vpow2.f32 %v660_v9  ;;  %v648_v11 = vsub.f32 %v1319_v24, %v619_v18  ;;  %v649_v10 = vsub.f32 %v1356_v32, %v624_v36 }
 0x22b   :  { %v1002_v13 = vpop.eup %1001 }
 0x22c   :  { %v676_v41 = vmul.f32 1.442695, %v648_v11  ;;  %690 = vadd.xlane.f32.xlu1 %v1002_v13  ;;  %v678_v42 = vmul.f32 1.442695, %v649_v10  ;;  %v492_v11 = vmul.f32 1.442695, %v476_v50  ;;  %v1673_v13 = vsub.f32 %v1360_v33, %v1365_v37 }
 0x22d   :  { %v594_v22 = vpop.permute.xlu1 %593  ;;  %v634_v1 = vpop.permute.xlu0 %633  ;;  %v1677_v33 = vsub.f32 %v1391_v49, %v1407_v57  ;;  %v1680_v49 = vsub.f32 %v1449_v16, %v1463_v25 }
 0x22e   :  { %v643_v23 = vsub.f32 %v1296_v14, %v594_v22  ;;  %1013 = vpow2.f32 %v676_v41  ;;  %v651_v60 = vsub.f32 %v1309_v20, %v634_v1  ;;  %v496_v20 = vmul.f32 1.442695, %v478_v43 }
 0x22f   :  { %v1004_v54 = vpop.eup %1003  ;;  %v512_v41 = vmul.f32 1.442695, %v1673_v13  ;;  %v1674_v22 = vsub.f32 %v1389_v48, %v1404_v56  ;;  %v514_v37 = vmul.f32 1.442695, %v1677_v33  ;;  %v1678_v48 = vsub.f32 %v1429_v4, %v1444_v12 }
 0x230   :  { %v1006_v40 = vpop.eup %1005  ;;  %v666_v21 = vmul.f32 1.442695, %v643_v23  ;;  %686 = vadd.xlane.f32.xlu0 %v1004_v54  ;;  %v1675_v23 = vsub.f32 %v1372_v39, %v1387_v47  ;;  %v1679_v47 = vsub.f32 %v1409_v58, %v1424_v0  ;;  %v524_v54 = vld [vmem:[#allocation3] sm:$0xff]  ;;  %v500_v57 = vmul.f32 1.442695, %v1680_v49 }
 0x231   :  { %706 = vadd.xlane.f32.xlu1 %v1006_v40  ;;  %v584_v19 = vpop.permute.xlu1 %583  ;;  %v508_v36 = vmul.f32 1.442695, %v1674_v22  ;;  %v504_v50 = vmul.f32 1.442695, %v1678_v48  ;;  %v532_v0 = vld [vmem:[#allocation3 + $0x40] sm:$0xff]  ;;  %v1681_v1 = vsub.f32 %v1468_v29, %v1482_v52  ;;  %v525_v29 = vld [vmem:[#allocation3 + $0x8] sm:$0xff] }
 0x232   :  { %v641_v35 = vsub.f32 %v1322_v27, %v584_v19  ;;  %1015 = vpow2.f32 %v666_v21  ;;  %v682_v27 = vmul.f32 1.442695, %v651_v60  ;;  %v498_v34 = vmul.f32 1.442695, %v1675_v23  ;;  %v534_v19 = vld [vmem:[#allocation3 + $0x50] sm:$0xff] }
 0x233   :  { %v1008_v6 = vpop.eup %1007  ;;  %v510_v59 = vmul.f32 1.442695, %v1679_v47  ;;  %v530_v22 = vld [vmem:[#allocation3 + $0x30] sm:$0xff] }
 0x234   :  { %v1010_v24 = vpop.eup %1009  ;;  %v662_v51 = vmul.f32 1.442695, %v641_v35  ;;  %696 = vadd.xlane.f32.xlu0 %v1008_v6 }
 0x235   :  { %702 = vadd.xlane.f32.xlu1 %v1010_v24  ;;  %v629_v55 = vpop.permute.xlu1 %628 }
 0x236   :  { %1017 = vpow2.f32 %v662_v51  ;;  %v650_v14 = vsub.f32 %v1354_v31, %v629_v55  ;;  %v516_v51 = vmul.f32 1.442695, %v1681_v1  ;;  %v531_v1 = vld [vmem:[#allocation3 + $0x38] sm:$0xff] }
 0x237   :  { %v1012_v2 = vpop.eup %1011 }
 0x238   :  { %v680_v61 = vmul.f32 1.442695, %v650_v14  ;;  %692 = vadd.xlane.f32.xlu0 %v1012_v2  ;;  %v527_v14 = vld [vmem:[#allocation3 + $0x18] sm:$0xff]  ;;  %v1682_v2 = vsub.f32 %v1431_v5, %v1447_v15 }
 0x23a   :  { %1019 = vpow2.f32 %v680_v61 }
 0x23b   :  { %1021 = vpow2.f32 %v678_v42  ;;  %v1014_v32 = vpop.eup %1013  ;;  %v506_v42 = vmul.f32 1.442695, %v1682_v2 }
 0x23c   :  { %708 = vadd.xlane.f32.xlu0 %v1014_v32  ;;  %1023 = vpow2.f32 %v682_v27 }
 0x23d   :  { %1025 = vpow2.f32 %v496_v20 }
 0x23e   :  { %1027 = vpow2.f32 %v492_v11 }
 0x23f   :  { %v1016_v8 = vpop.eup %1015  ;;  %1029 = vpow2.f32 %v512_v41 }
 0x240   :  { %698 = vadd.xlane.f32.xlu1 %v1016_v8  ;;  %1031 = vpow2.f32 %v508_v36 }
 0x241   :  { %1033 = vpow2.f32 %v498_v34 }
 0x242   :  { %1035 = vpow2.f32 %v494_v38  ;;  %v1684_v38 = vsub.f32 %v1487_v62, %v1501_v44  ;;  %v1686_v44 = vsub.f32 %v1451_v17, %v1466_v26 }
 0x243   :  { %v1018_v7 = vpop.eup %1017  ;;  %1037 = vpow2.f32 %v514_v37 }
 0x244   :  { %694 = vadd.xlane.f32.xlu1 %v1018_v7  ;;  %1039 = vpow2.f32 %v504_v50  ;;  %v535_v7 = vld [vmem:[#allocation3 + $0x58] sm:$0xff] }
 0x245   :  { %1041 = vpow2.f32 %v510_v59  ;;  %v522_v59 = vmul.f32 1.442695, %v1686_v44 }
 0x246   :  { %1043 = vpow2.f32 %v500_v57  ;;  %v536_v57 = vld [vmem:[#allocation3 + $0x60] sm:$0xff] }
 0x247   :  { %v1020_v9 = vpop.eup %1019 }
 0x248   :  { %v1022_v18 = vpop.eup %1021  ;;  %712 = vadd.xlane.f32.xlu0 %v1020_v9 }
 0x249   :  { %710 = vadd.xlane.f32.xlu1 %v1022_v18  ;;  %v1024_v31 = vpop.eup %1023 }
 0x24a   :  { %v1026_v43 = vpop.eup %1025 }
 0x24b   :  { %v542_v56 = vmul.f32 %v1026_v43, %v526_v46  ;;  %v1028_v39 = vpop.eup %1027  ;;  %v520_v43 = vmul.f32 1.442695, %v1684_v38 }
 0x24c   :  { %v1030_v40 = vpop.eup %1029  ;;  %v540_v4 = vmul.f32 %v1028_v39, %v524_v54  ;;  %v528_v39 = vld [vmem:[#allocation3 + $0x20] sm:$0xff] }
 0x24d   :  { %714 = vadd.xlane.f32.xlu1 %v1024_v31  ;;  %v550_v12 = vmul.f32 %v1030_v40, %v534_v19  ;;  %v1032_v6 = vpop.eup %1031  ;;  %v1683_v31 = vsub.f32 %v1470_v30, %v1485_v53  ;;  %v1685_v53 = vsub.f32 %v1489_v63, %v1504_v45 }
 0x24e   :  { %v548_v16 = vmul.f32 %v1032_v6, %v532_v0  ;;  %v1034_v25 = vpop.eup %1033 }
 0x24f   :  { %v1036_v27 = vpop.eup %1035  ;;  %v543_v32 = vmul.f32 %v1034_v25, %v527_v14  ;;  %v502_v5 = vmul.f32 1.442695, %v1683_v31  ;;  %v518_v33 = vmul.f32 1.442695, %v1685_v53  ;;  %v778_v14 = vld [vmem:[#allocation2 + $0x50] sm:$0xff]  ;;  %v776_v31 = vld [vmem:[#allocation2 + $0x40] sm:$0xff] }
 0x250   :  { %v1038_v52 = vpop.eup %1037  ;;  %v541_v20 = vmul.f32 %v1036_v27, %v525_v29 }
 0x251   :  { %v1040_v11 = vpop.eup %1039  ;;  %v551_v41 = vmul.f32 %v1038_v52, %v535_v7  ;;  %v529_v52 = vld [vmem:[#allocation3 + $0x28] sm:$0xff] }
 0x252   :  { %v1042_v36 = vpop.eup %1041  ;;  %v546_v46 = vmul.f32 %v1040_v11, %v530_v22  ;;  %v538_v11 = vld [vmem:[#allocation3 + $0x70] sm:$0xff]  ;;  %v537_v22 = vld [vmem:[#allocation3 + $0x68] sm:$0xff] }
 0x253   :  { %v1044_v48 = vpop.eup %1043 }
 0x2a9   :  { %v689_v3 = vpop.xlane.xlu0 %688 }
 0x2aa   :  { %v718_v21 = vadd.f32 %v689_v3, %v542_v56  ;;  %v549_v56 = vmul.f32 %v1042_v36, %v533_v28  ;;  %v544_v3 = vmul.f32 %v1044_v48, %v528_v39  ;;  %v771_v28 = vld [vmem:[#allocation2 + $0x18] sm:$0xff] }
 0x2ab   :  { %v539_v39 = vld [vmem:[#allocation3 + $0x78] sm:$0xff] }
 0x2ac   :  { %735 = vst.msk [vmem:[#allocation3 + $0x10] sm:$0xff] %vm16_vm1, %v718_v21 }
 0x2ad   :  { %v685_v35 = vpop.xlane.xlu1 %684 }
 0x2ae   :  { %v705_v10 = vpop.xlane.xlu0 %704  ;;  %v716_v58 = vadd.f32 %v685_v35, %v540_v4  ;;  %v770_v4 = vld [vmem:[#allocation2 + $0x10] sm:$0xff] }
 0x2af   :  { %v726_v24 = vadd.f32 %v705_v10, %v550_v12 }
 0x2b0   :  { %733 = vst.msk [vmem:[#allocation3] sm:$0xff] %vm16_vm1, %v716_v58 }
 0x2b1   :  { %743 = vst.msk [vmem:[#allocation3 + $0x50] sm:$0xff] %vm16_vm1, %v726_v24 }
 0x2b2   :  { %v701_v55 = vpop.xlane.xlu0 %700 }
 0x2b3   :  { %v786_v60 = vld [vmem:[#allocation3 + $0x10] sm:$0xff]  ;;  %v724_v61 = vadd.f32 %v701_v55, %v548_v16 }
 0x2b4   :  { %1045 = vlog2.f32 %v786_v60 }
 0x2b5   :  { %1047 = vpow2.f32 %v516_v51  ;;  %741 = vst.msk [vmem:[#allocation3 + $0x40] sm:$0xff] %vm16_vm1, %v724_v61  ;;  %v691_v8 = vpop.xlane.xlu1 %690  ;;  %v768_v51 = vld [vmem:[#allocation2] sm:$0xff] }
 0x2b6   :  { %1049 = vpow2.f32 %v506_v42  ;;  %v719_v18 = vadd.f32 %v691_v8, %v543_v32 }
 0x2b7   :  { %v784_v9 = vld [vmem:[#allocation3] sm:$0xff] }
 0x2b8   :  { %v794_v15 = vld [vmem:[#allocation3 + $0x50] sm:$0xff]  ;;  %1051 = vlog2.f32 %v784_v9  ;;  %736 = vst.msk [vmem:[#allocation3 + $0x18] sm:$0xff] %vm16_vm1, %v719_v18 }
 0x2b9   :  { %1053 = vlog2.f32 %v794_v15  ;;  %v687_v13 = vpop.xlane.xlu0 %686 }
 0x2ba   :  { %v717_v23 = vadd.f32 %v687_v13, %v541_v20  ;;  %v707_v34 = vpop.xlane.xlu1 %706  ;;  %1055 = vpow2.f32 %v502_v5 }
 0x2bb   :  { %v727_v30 = vadd.f32 %v707_v34, %v551_v41 }
 0x2bc   :  { %v792_v37 = vld [vmem:[#allocation3 + $0x40] sm:$0xff]  ;;  %734 = vst.msk [vmem:[#allocation3 + $0x8] sm:$0xff] %vm16_vm1, %v717_v23 }
 0x2bd   :  { %1057 = vlog2.f32 %v792_v37  ;;  %744 = vst.msk [vmem:[#allocation3 + $0x58] sm:$0xff] %vm16_vm1, %v727_v30  ;;  %v697_v50 = vpop.xlane.xlu0 %696 }
 0x2be   :  { %v722_v47 = vadd.f32 %v697_v50, %v546_v46  ;;  %v703_v62 = vpop.xlane.xlu1 %702  ;;  %1059 = vpow2.f32 %v520_v43 }
 0x2bf   :  { %v725_v63 = vadd.f32 %v703_v62, %v549_v56  ;;  %1061 = vpow2.f32 %v518_v33  ;;  %v787_v45 = vld [vmem:[#allocation3 + $0x18] sm:$0xff] }
 0x2c0   :  { %739 = vst.msk [vmem:[#allocation3 + $0x30] sm:$0xff] %vm16_vm1, %v722_v47  ;;  %1063 = vlog2.f32 %v787_v45  ;;  %v769_v47 = vld [vmem:[#allocation2 + $0x8] sm:$0xff] }
 0x2c1   :  { %v1046_v54 = vpop.eup %1045  ;;  %742 = vst.msk [vmem:[#allocation3 + $0x48] sm:$0xff] %vm16_vm1, %v725_v63  ;;  %v693_v40 = vpop.xlane.xlu0 %692  ;;  %1065 = vpow2.f32 %v522_v59  ;;  %v779_v59 = vld [vmem:[#allocation2 + $0x58] sm:$0xff] }
 0x2c2   :  { %v1048_v21 = vpop.eup %1047  ;;  %v805_v19 = vmul.f32 0.6931472, %v1046_v54  ;;  %v720_v49 = vadd.f32 %v693_v40, %v544_v3 }
 0x2c3   :  { %v785_v17 = vld [vmem:[#allocation3 + $0x8] sm:$0xff]  ;;  %v1050_v26 = vpop.eup %1049  ;;  %v552_v10 = vmul.f32 %v1048_v21, %v536_v57  ;;  %v774_v57 = vld [vmem:[#allocation2 + $0x30] sm:$0xff] }
 0x2c4   :  { %v834_v12 = vadd.f32 %v805_v19, %v770_v4  ;;  %1067 = vlog2.f32 %v785_v17  ;;  %v795_v35 = vld [vmem:[#allocation3 + $0x58] sm:$0xff]  ;;  %737 = vst.msk [vmem:[#allocation3 + $0x20] sm:$0xff] %vm16_vm1, %v720_v49  ;;  %v547_v27 = vmul.f32 %v1050_v26, %v531_v1  ;;  %v777_v26 = vld [vmem:[#allocation2 + $0x48] sm:$0xff] }
 0x2c5   :  { %v1052_v6 = vpop.eup %1051  ;;  %1069 = vlog2.f32 %v795_v35  ;;  %v709_v24 = vpop.xlane.xlu0 %708 }
 0x2c6   :  { %v1054_v58 = vpop.eup %1053  ;;  %850 = vst.msk [vmem:[%s1666_s2 + $0x10] sm:$0xff] %vm16_vm1, %v834_v12  ;;  %v801_v0 = vmul.f32 0.6931472, %v1052_v6  ;;  %v728_v55 = vadd.f32 %v709_v24, %v552_v10 }
 0x2c7   :  { %v821_v16 = vmul.f32 0.6931472, %v1054_v58  ;;  %v790_v25 = vld [vmem:[#allocation3 + $0x30] sm:$0xff]  ;;  %v1056_v60 = vpop.eup %1055 }
 0x2c8   :  { %v832_v2 = vadd.f32 %v801_v0, %v768_v51  ;;  %1071 = vlog2.f32 %v790_v25  ;;  %v793_v42 = vld [vmem:[#allocation3 + $0x48] sm:$0xff]  ;;  %745 = vst.msk [vmem:[#allocation3 + $0x60] sm:$0xff] %vm16_vm1, %v728_v55  ;;  %v545_v20 = vmul.f32 %v1056_v60, %v529_v52  ;;  %v772_v0 = vld [vmem:[#allocation2 + $0x20] sm:$0xff] }
 0x2c9   :  { %v842_v61 = vadd.f32 %v821_v16, %v778_v14  ;;  %1073 = vlog2.f32 %v793_v42  ;;  %v699_v29 = vpop.xlane.xlu1 %698  ;;  %v780_v55 = vld [vmem:[#allocation2 + $0x60] sm:$0xff]  ;;  %v773_v52 = vld [vmem:[#allocation2 + $0x28] sm:$0xff] }
 0x2ca   :  { %v1058_v32 = vpop.eup %1057  ;;  %848 = vst.msk [vmem:[%s1666_s2] sm:$0xff] %vm16_vm1, %v832_v2  ;;  %v723_v9 = vadd.f32 %v699_v29, %v547_v27 }
 0x2cb   :  { %858 = vst.msk [vmem:[%s1666_s2 + $0x50] sm:$0xff] %vm16_vm1, %v842_v61  ;;  %v817_v8 = vmul.f32 0.6931472, %v1058_v32  ;;  %v788_v7 = vld [vmem:[#allocation3 + $0x20] sm:$0xff]  ;;  %v1060_v18 = vpop.eup %1059  ;;  %v775_v61 = vld [vmem:[#allocation2 + $0x38] sm:$0xff] }
 0x2cc   :  { %1075 = vlog2.f32 %v788_v7  ;;  %v1062_v5 = vpop.eup %1061  ;;  %740 = vst.msk [vmem:[#allocation3 + $0x38] sm:$0xff] %vm16_vm1, %v723_v9  ;;  %v554_v43 = vmul.f32 %v1060_v18, %v538_v11 }
 0x2cd   :  { %v840_v15 = vadd.f32 %v817_v8, %v776_v31  ;;  %v1064_v13 = vpop.eup %1063  ;;  %v695_v41 = vpop.xlane.xlu1 %694  ;;  %v553_v37 = vmul.f32 %v1062_v5, %v537_v22  ;;  %v782_v31 = vld [vmem:[#allocation2 + $0x70] sm:$0xff]  ;;  %v783_v22 = vld [vmem:[#allocation2 + $0x78] sm:$0xff] }
 0x2ce   :  { %v807_v36 = vmul.f32 0.6931472, %v1064_v13  ;;  %v721_v23 = vadd.f32 %v695_v41, %v545_v20  ;;  %v1066_v34 = vpop.eup %1065 }
 0x2cf   :  { %856 = vst.msk [vmem:[%s1666_s2 + $0x40] sm:$0xff] %vm16_vm1, %v840_v15  ;;  %v796_v38 = vld [vmem:[#allocation3 + $0x60] sm:$0xff]  ;;  %v555_v40 = vmul.f32 %v1066_v34, %v539_v39  ;;  %v781_v15 = vld [vmem:[#allocation2 + $0x68] sm:$0xff] }
 0x2d0   :  { %v835_v53 = vadd.f32 %v807_v36, %v771_v28  ;;  %1077 = vlog2.f32 %v796_v38  ;;  %738 = vst.msk [vmem:[#allocation3 + $0x28] sm:$0xff] %vm16_vm1, %v721_v23 }
 0x2d1   :  { %v1068_v30 = vpop.eup %1067  ;;  %v713_v33 = vpop.xlane.xlu0 %712 }
 0x2d2   :  { %v1070_v46 = vpop.eup %1069  ;;  %v803_v48 = vmul.f32 0.6931472, %v1068_v30  ;;  %v730_v50 = vadd.f32 %v713_v33, %v554_v43  ;;  %v711_v56 = vpop.xlane.xlu1 %710  ;;  %851 = vst.msk [vmem:[%s1666_s2 + $0x18] sm:$0xff] %vm16_vm1, %v835_v53 }
 0x2d3   :  { %v823_v62 = vmul.f32 0.6931472, %v1070_v46  ;;  %v729_v44 = vadd.f32 %v711_v56, %v553_v37  ;;  %v791_v45 = vld [vmem:[#allocation3 + $0x38] sm:$0xff] }
 0x2d4   :  { %v833_v63 = vadd.f32 %v803_v48, %v769_v47  ;;  %747 = vst.msk [vmem:[#allocation3 + $0x70] sm:$0xff] %vm16_vm1, %v730_v50  ;;  %1079 = vlog2.f32 %v791_v45 }
 0x2d5   :  { %v1072_v3 = vpop.eup %1071  ;;  %v843_v54 = vadd.f32 %v823_v62, %v779_v59  ;;  %746 = vst.msk [vmem:[#allocation3 + $0x68] sm:$0xff] %vm16_vm1, %v729_v44 }
 0x2d6   :  { %v1074_v21 = vpop.eup %1073  ;;  %849 = vst.msk [vmem:[%s1666_s2 + $0x8] sm:$0xff] %vm16_vm1, %v833_v63  ;;  %v813_v19 = vmul.f32 0.6931472, %v1072_v3  ;;  %v715_v49 = vpop.xlane.xlu1 %714 }
 0x2d7   :  { %859 = vst.msk [vmem:[%s1666_s2 + $0x58] sm:$0xff] %vm16_vm1, %v843_v54  ;;  %v819_v4 = vmul.f32 0.6931472, %v1074_v21  ;;  %v731_v17 = vadd.f32 %v715_v49, %v555_v40  ;;  %v789_v35 = vld [vmem:[#allocation3 + $0x28] sm:$0xff] }
 0x2d8   :  { %v838_v12 = vadd.f32 %v813_v19, %v774_v57  ;;  %1081 = vlog2.f32 %v789_v35 }
 0x2d9   :  { %v1076_v6 = vpop.eup %1075  ;;  %v841_v10 = vadd.f32 %v819_v4, %v777_v26  ;;  %748 = vst.msk [vmem:[#allocation3 + $0x78] sm:$0xff] %vm16_vm1, %v731_v17 }
 0x2da   :  { %854 = vst.msk [vmem:[%s1666_s2 + $0x30] sm:$0xff] %vm16_vm1, %v838_v12  ;;  %v809_v58 = vmul.f32 0.6931472, %v1076_v6 }
 0x2db   :  { %857 = vst.msk [vmem:[%s1666_s2 + $0x48] sm:$0xff] %vm16_vm1, %v841_v10  ;;  %v798_v24 = vld [vmem:[#allocation3 + $0x70] sm:$0xff] }
 0x2dc   :  { %v836_v1 = vadd.f32 %v809_v58, %v772_v0  ;;  %1083 = vlog2.f32 %v798_v24  ;;  %v797_v51 = vld [vmem:[#allocation3 + $0x68] sm:$0xff] }
 0x2dd   :  { %1085 = vlog2.f32 %v797_v51  ;;  %v1078_v16 = vpop.eup %1077 }
 0x2de   :  { %852 = vst.msk [vmem:[%s1666_s2 + $0x20] sm:$0xff] %vm16_vm1, %v836_v1  ;;  %v825_v25 = vmul.f32 0.6931472, %v1078_v16 }
 0x2e0   :  { %v799_v14 = vld [vmem:[#allocation3 + $0x78] sm:$0xff]  ;;  %v844_v2 = vadd.f32 %v825_v25, %v780_v55 }
 0x2e1   :  { %1087 = vlog2.f32 %v799_v14  ;;  %v1080_v42 = vpop.eup %1079 }
 0x2e2   :  { %860 = vst.msk [vmem:[%s1666_s2 + $0x60] sm:$0xff] %vm16_vm1, %v844_v2  ;;  %v815_v60 = vmul.f32 0.6931472, %v1080_v42 }
 0x2e4   :  { %v839_v27 = vadd.f32 %v815_v60, %v775_v61 }
 0x2e5   :  { %v1082_v32 = vpop.eup %1081 }
 0x2e6   :  { %855 = vst.msk [vmem:[%s1666_s2 + $0x38] sm:$0xff] %vm16_vm1, %v839_v27  ;;  %v811_v29 = vmul.f32 0.6931472, %v1082_v32 }
 0x2e8   :  { %v837_v7 = vadd.f32 %v811_v29, %v773_v52 }
 0x2e9   :  { %v1084_v8 = vpop.eup %1083 }
 0x2ea   :  { %v1086_v9 = vpop.eup %1085  ;;  %v829_v18 = vmul.f32 0.6931472, %v1084_v8  ;;  %853 = vst.msk [vmem:[%s1666_s2 + $0x28] sm:$0xff] %vm16_vm1, %v837_v7 }
 0x2eb   :  { %v827_v5 = vmul.f32 0.6931472, %v1086_v9 }
 0x2ec   :  { %v846_v20 = vadd.f32 %v829_v18, %v782_v31 }
 0x2ed   :  { %v845_v11 = vadd.f32 %v827_v5, %v781_v15 }
 0x2ee   :  { %v1088_v13 = vpop.eup %1087  ;;  %862 = vst.msk [vmem:[%s1666_s2 + $0x70] sm:$0xff] %vm16_vm1, %v846_v20 }
 0x2ef   :  { %861 = vst.msk [vmem:[%s1666_s2 + $0x68] sm:$0xff] %vm16_vm1, %v845_v11  ;;  %v831_v41 = vmul.f32 0.6931472, %v1088_v13 }
 0x2f1   :  { %v847_v36 = vadd.f32 %v831_v41, %v783_v22 }
 0x2f3   :  { %863 = vst.msk [vmem:[%s1666_s2 + $0x78] sm:$0xff] %vm16_vm1, %v847_v36 }

</bundles_post_ra>
